<compile_context>
chip_gen: v7x
topology: tpu7x:2x2x1
jax: 0.10.0
libtpu: 0.0.40
codegen_flags: <defaults>
</compile_context>

<pallas_src>
import functools

import jax
import jax.numpy as jnp
import numpy as np
from jax.experimental import pallas as pl
from jax.experimental.pallas import tpu as pltpu


def _basic_block_kernel(x_ref, mask_ref, w1_ref, w2_ref, out_ref, *, shifts, L):
    """One grid step = Nb batch images folded onto lanes.

    x_ref    : (1, C_pad, L)        input, L = Nb*H*W (channels on sublanes)
    mask_ref : (9*C_pad, L) f32     0/1 border-validity mask, row t*C_pad + c
    w1_ref   : (C_pad, 9*C_pad) bf16  conv1 weights, K ordered (tap, cin)
    w2_ref   : (C_pad, 9*C_pad) bf16  conv2 weights
    out_ref  : (1, C_pad, L)
    """
    x = x_ref[0].astype(jnp.float32)                    # (C_pad, L)
    mask = mask_ref[...]                                # (9*C_pad, L) f32

    def im2col_bf16(a):
        # a: (C_pad, L) f32 -> (9*C_pad, L) bf16.  Rolls run on the XLU; the
        # single f32 mask-multiply zeroes both the image borders and any
        # wrap-around across image boundaries in the folded lane dimension.
        cols = [a if s == 0 else pltpu.roll(a, (-s) % L, axis=1) for s in shifts]
        stacked = jnp.concatenate(cols, axis=0)         # aligned: C_pad % 8 == 0
        return (stacked * mask).astype(jnp.bfloat16)

    # conv1 (3x3, stride 1, pad 1) + ReLU : one bf16 MXU matmul, K = 9*C_pad.
    mid = jnp.maximum(
        jnp.dot(w1_ref[...], im2col_bf16(x),
                preferred_element_type=jnp.float32), 0.0)        # (C_pad, L) f32

    # conv2 + residual add + ReLU : one bf16 MXU matmul.
    out = jnp.dot(w2_ref[...], im2col_bf16(mid),
                  preferred_element_type=jnp.float32)            # (C_pad, L) f32
    out_ref[0] = jnp.maximum(out + x, 0.0).astype(out_ref.dtype)


def basic_block_nchw(x_nchw, w1_oihw, w2_oihw, *, nb=None):
    """PyTorch-convention entry point: NCHW input, OIHW conv weights.

    stride=1 / downsample=None  =>  inplanes == planes.
    """
    N, C, H, W = x_nchw.shape
    Cout, Cin = w1_oihw.shape[:2]
    assert Cin == C and Cout == C and w2_oihw.shape[:2] == (C, C), \
        "stride=1 / downsample=None requires inplanes == planes"
    P = H * W

    SUB = 16                                   # bf16 sublane tile (also mult. of 8 for f32)
    C_pad = ((max(C, 1) + SUB - 1) // SUB) * SUB

    # ---- batch folding: Nb images per grid step, folded onto lanes ----------
    if nb is None:
        nb = max(1, min(N, 2048 // P))         # cap folded lane width ~2048
        while nb > 1 and pl.cdiv(N, nb) < 2:   # keep >= 2 parallel steps (v7x: 2 TCs)
            nb //= 2
    S = pl.cdiv(N, nb)
    N_pad = S * nb
    L = nb * P

    x = x_nchw.reshape(N, C, P).astype(jnp.float32)
    x = jnp.pad(x, ((0, N_pad - N), (0, C_pad - C), (0, 0)))
    # (S, nb, C_pad, P) -> (S, C_pad, nb, P) -> (S, C_pad, nb*P): lane = nb_local*P + p
    x = x.reshape(S, nb, C_pad, P).transpose(0, 2, 1, 3).reshape(S, C_pad, L)

    def prep_w(w):
        # (O, I, 3, 3) -> (O, 3, 3, I), zero-pad to (C_pad, 3, 3, C_pad), flatten K.
        w = jnp.transpose(w, (0, 2, 3, 1)).astype(jnp.float32)
        w = jnp.pad(w, ((0, C_pad - Cout), (0, 0), (0, 0), (0, C_pad - C)))
        return w.reshape(C_pad, 9 * C_pad).astype(jnp.bfloat16)   # col = tap*C_pad + cin

    w1 = prep_w(w1_oihw)
    w2 = prep_w(w2_oihw)

    # (9, P) border-validity mask -> (9*C_pad, L): row t*C_pad + c, lane nb*P + p.
    pos = jnp.arange(P)
    hh, ww = pos // W, pos % W
    shifts, rows = [], []
    for dh in (-1, 0, 1):
        for dw in (-1, 0, 1):
            shifts.append(dh * W + dw)
            rows.append((hh + dh >= 0) & (hh + dh < H) & (ww + dw >= 0) & (ww + dw < W))
    mask = jnp.stack(rows).astype(jnp.float32)        # (9, P)
    mask = jnp.repeat(mask, C_pad, axis=0)            # (9*C_pad, P)
    mask = jnp.tile(mask, (1, nb))                    # (9*C_pad, L)

    flops = S * 2 * (2 * C_pad * (9 * C_pad) * L)     # two 3x3 convs (padded dims)
    bytes_accessed = (4 * (x.size + S * C_pad * L + mask.size)
                      + 2 * (w1.size + w2.size))

    out = pl.pallas_call(
        functools.partial(_basic_block_kernel, shifts=tuple(shifts), L=L),
        out_shape=jax.ShapeDtypeStruct((S, C_pad, L), x_nchw.dtype),
        grid_spec=pltpu.PrefetchScalarGridSpec(
            num_scalar_prefetch=0,
            grid=(S,),
            in_specs=[
                pl.BlockSpec((1, C_pad, L), lambda s: (s, 0, 0)),
                pl.BlockSpec((9 * C_pad, L), lambda s: (0, 0)),        # resident
                pl.BlockSpec((C_pad, 9 * C_pad), lambda s: (0, 0)),    # resident
                pl.BlockSpec((C_pad, 9 * C_pad), lambda s: (0, 0)),    # resident
            ],
            out_specs=pl.BlockSpec((1, C_pad, L), lambda s: (s, 0, 0)),
        ),
        compiler_params=pltpu.CompilerParams(
            dimension_semantics=("parallel",)),        # both TCs on v7x
        cost_estimate=pl.CostEstimate(
            flops=flops, transcendentals=0, bytes_accessed=bytes_accessed),
    )(x, mask, w1, w2)

    # Undo batch fold + padding: (S, C_pad, L) -> (N, C, H, W).
    out = out.reshape(S, C_pad, nb, P).transpose(0, 2, 1, 3).reshape(N_pad, C_pad, P)
    return out[:N, :C].reshape(N, C, H, W)


def _reference_nchw(x_nchw, w1_oihw, w2_oihw):
    """Pure-JAX f32 reference (mirrors the PyTorch forward)."""
    dn = jax.lax.conv_dimension_numbers(x_nchw.shape, w1_oihw.shape,
                                        ("NCHW", "OIHW", "NCHW"))
    out = jax.lax.conv_general_dilated(
        x_nchw, w1_oihw, (1, 1), [(1, 1), (1, 1)], dimension_numbers=dn)
    out = jnp.maximum(out, 0.0)
    out = jax.lax.conv_general_dilated(
        out, w2_oihw, (1, 1), [(1, 1), (1, 1)], dimension_numbers=dn)
    out = out + x_nchw
    return jnp.maximum(out, 0.0)


if __name__ == "__main__":
    # BasicBlock(inplanes=4, planes=4, stride=1, downsample=None)
    N, C, H, W = 2, 4, 16, 16
    key = jax.random.PRNGKey(0)
    kx, k1, k2 = jax.random.split(key, 3)

    x = jax.random.normal(kx, (N, C, H, W), dtype=jnp.float32)
    # PyTorch conv weight shape: (out_planes, in_planes, 3, 3), bias=False
    w1 = jax.random.normal(k1, (C, C, 3, 3), dtype=jnp.float32) * 0.1
    w2 = jax.random.normal(k2, (C, C, 3, 3), dtype=jnp.float32) * 0.1

    out = jax.block_until_ready(basic_block_nchw(x, w1, w2))
    ref = jax.block_until_ready(_reference_nchw(x, w1, w2))
    # Tolerance reflects bf16 MXU operands (f32 accumulation, f32 epilogue).
    np.testing.assert_allclose(np.asarray(out), np.asarray(ref),
                               rtol=3e-2, atol=3e-2)

    print("KERNEL_OK")
</pallas_src>

<mosaic_0001>
module attributes {stable_mosaic.version = 11 : i64} {
  func.func @_basic_block_kernel(%arg0: i32, %arg1: memref<1x16x256xf32, #tpu.memory_space<vmem>>, %arg2: memref<144x256xf32, #tpu.memory_space<vmem>>, %arg3: memref<16x144xbf16, #tpu.memory_space<vmem>>, %arg4: memref<16x144xbf16, #tpu.memory_space<vmem>>, %arg5: memref<1x16x256xf32, #tpu.memory_space<vmem>>) attributes {dimension_semantics = [#tpu.dimension_semantics<parallel>], iteration_bounds = array<i64: 2>, scalar_prefetch = 0 : i64, scratch_operands = 0 : i64, tpu.core_type = #tpu.core_type<tc>, window_params = [{transform_indices = @transform_0, window_bounds = array<i64: 1, 16, 256>}, {pipeline_mode = #tpu.pipeline_mode<synchronous>, transform_indices = @transform_1, window_bounds = array<i64: 144, 256>}, {pipeline_mode = #tpu.pipeline_mode<synchronous>, transform_indices = @transform_2, window_bounds = array<i64: 16, 144>}, {pipeline_mode = #tpu.pipeline_mode<synchronous>, transform_indices = @transform_3, window_bounds = array<i64: 16, 144>}, {transform_indices = @transform_4, window_bounds = array<i64: 1, 16, 256>}]} {
    %c0 = arith.constant 0 : index
    %c0_0 = arith.constant 0 : index
    %c0_1 = arith.constant 0 : index
    %0 = vector.load %arg1[%c0, %c0_0, %c0_1] : memref<1x16x256xf32, #tpu.memory_space<vmem>>, vector<1x16x256xf32>
    %1 = vector.shape_cast %0 : vector<1x16x256xf32> to vector<16x256xf32>
    %c0_2 = arith.constant 0 : index
    %c0_3 = arith.constant 0 : index
    %2 = vector.load %arg2[%c0_2, %c0_3] : memref<144x256xf32, #tpu.memory_space<vmem>>, vector<144x256xf32>
    %c0_4 = arith.constant 0 : index
    %c0_5 = arith.constant 0 : index
    %3 = vector.load %arg3[%c0_4, %c0_5] : memref<16x144xbf16, #tpu.memory_space<vmem>>, vector<16x144xbf16>
    %c17_i32 = arith.constant 17 : i32
    %4 = tpu.dynamic_rotate %1 by %c17_i32 dim 1 : vector<16x256xf32>, i32 -> vector<16x256xf32>
    %c16_i32 = arith.constant 16 : i32
    %5 = tpu.dynamic_rotate %1 by %c16_i32 dim 1 : vector<16x256xf32>, i32 -> vector<16x256xf32>
    %c15_i32 = arith.constant 15 : i32
    %6 = tpu.dynamic_rotate %1 by %c15_i32 dim 1 : vector<16x256xf32>, i32 -> vector<16x256xf32>
    %c1_i32 = arith.constant 1 : i32
    %7 = tpu.dynamic_rotate %1 by %c1_i32 dim 1 : vector<16x256xf32>, i32 -> vector<16x256xf32>
    %c255_i32 = arith.constant 255 : i32
    %8 = tpu.dynamic_rotate %1 by %c255_i32 dim 1 : vector<16x256xf32>, i32 -> vector<16x256xf32>
    %c241_i32 = arith.constant 241 : i32
    %9 = tpu.dynamic_rotate %1 by %c241_i32 dim 1 : vector<16x256xf32>, i32 -> vector<16x256xf32>
    %c240_i32 = arith.constant 240 : i32
    %10 = tpu.dynamic_rotate %1 by %c240_i32 dim 1 : vector<16x256xf32>, i32 -> vector<16x256xf32>
    %c239_i32 = arith.constant 239 : i32
    %11 = tpu.dynamic_rotate %1 by %c239_i32 dim 1 : vector<16x256xf32>, i32 -> vector<16x256xf32>
    %12 = tpu.concatenate %4, %5, %6, %7, %1, %8, %9, %10, %11 in 0 : vector<16x256xf32>, vector<16x256xf32>, vector<16x256xf32>, vector<16x256xf32>, vector<16x256xf32>, vector<16x256xf32>, vector<16x256xf32>, vector<16x256xf32>, vector<16x256xf32> -> vector<144x256xf32>
    %13 = arith.mulf %12, %2 : vector<144x256xf32>
    %14 = arith.truncf %13 : vector<144x256xf32> to vector<144x256xbf16>
    %cst = arith.constant dense<0.000000e+00> : vector<16x256xf32>
    %15 = tpu.matmul %3, %14, %cst {dimension_numbers = #tpu.dot_dimension_numbers<[1], [0], [0], [1], [0, 0, 1, 1], [], []>} : vector<16x144xbf16>, vector<144x256xbf16>, vector<16x256xf32> -> vector<16x256xf32>
    %cst_6 = arith.constant 0.000000e+00 : f32
    %16 = vector.broadcast %cst_6 : f32 to vector<16x256xf32>
    %17 = arith.maximumf %15, %16 : vector<16x256xf32>
    %c0_7 = arith.constant 0 : index
    %c0_8 = arith.constant 0 : index
    %18 = vector.load %arg4[%c0_7, %c0_8] : memref<16x144xbf16, #tpu.memory_space<vmem>>, vector<16x144xbf16>
    %c17_i32_9 = arith.constant 17 : i32
    %19 = tpu.dynamic_rotate %17 by %c17_i32_9 dim 1 : vector<16x256xf32>, i32 -> vector<16x256xf32>
    %c16_i32_10 = arith.constant 16 : i32
    %20 = tpu.dynamic_rotate %17 by %c16_i32_10 dim 1 : vector<16x256xf32>, i32 -> vector<16x256xf32>
    %c15_i32_11 = arith.constant 15 : i32
    %21 = tpu.dynamic_rotate %17 by %c15_i32_11 dim 1 : vector<16x256xf32>, i32 -> vector<16x256xf32>
    %c1_i32_12 = arith.constant 1 : i32
    %22 = tpu.dynamic_rotate %17 by %c1_i32_12 dim 1 : vector<16x256xf32>, i32 -> vector<16x256xf32>
    %c255_i32_13 = arith.constant 255 : i32
    %23 = tpu.dynamic_rotate %17 by %c255_i32_13 dim 1 : vector<16x256xf32>, i32 -> vector<16x256xf32>
    %c241_i32_14 = arith.constant 241 : i32
    %24 = tpu.dynamic_rotate %17 by %c241_i32_14 dim 1 : vector<16x256xf32>, i32 -> vector<16x256xf32>
    %c240_i32_15 = arith.constant 240 : i32
    %25 = tpu.dynamic_rotate %17 by %c240_i32_15 dim 1 : vector<16x256xf32>, i32 -> vector<16x256xf32>
    %c239_i32_16 = arith.constant 239 : i32
    %26 = tpu.dynamic_rotate %17 by %c239_i32_16 dim 1 : vector<16x256xf32>, i32 -> vector<16x256xf32>
    %27 = tpu.concatenate %19, %20, %21, %22, %17, %23, %24, %25, %26 in 0 : vector<16x256xf32>, vector<16x256xf32>, vector<16x256xf32>, vector<16x256xf32>, vector<16x256xf32>, vector<16x256xf32>, vector<16x256xf32>, vector<16x256xf32>, vector<16x256xf32> -> vector<144x256xf32>
    %28 = arith.mulf %27, %2 : vector<144x256xf32>
    %29 = arith.truncf %28 : vector<144x256xf32> to vector<144x256xbf16>
    %cst_17 = arith.constant dense<0.000000e+00> : vector<16x256xf32>
    %30 = tpu.matmul %18, %29, %cst_17 {dimension_numbers = #tpu.dot_dimension_numbers<[1], [0], [0], [1], [0, 0, 1, 1], [], []>} : vector<16x144xbf16>, vector<144x256xbf16>, vector<16x256xf32> -> vector<16x256xf32>
    %31 = arith.addf %30, %1 : vector<16x256xf32>
    %cst_18 = arith.constant 0.000000e+00 : f32
    %32 = vector.broadcast %cst_18 : f32 to vector<16x256xf32>
    %33 = arith.maximumf %31, %32 : vector<16x256xf32>
    %c0_19 = arith.constant 0 : index
    %c0_20 = arith.constant 0 : index
    %c0_21 = arith.constant 0 : index
    %34 = vector.load %arg5[%c0_19, %c0_20, %c0_21] : memref<1x16x256xf32, #tpu.memory_space<vmem>>, vector<1x16x256xf32>
    %35 = vector.shape_cast %34 : vector<1x16x256xf32> to vector<16x256xf32>
    %36 = vector.shape_cast %33 : vector<16x256xf32> to vector<1x16x256xf32>
    tpu.vector_store %arg5[%c0_19, %c0_20, %c0_21], %36 {strides = array<i32>} : memref<1x16x256xf32, #tpu.memory_space<vmem>>, vector<1x16x256xf32>,
    return
  }
  func.func @transform_0(%arg0: i32) -> (i32, i32, i32) {
    %c0_i32 = arith.constant 0 : i32
    %c0_i32_0 = arith.constant 0 : i32
    %c0_i32_1 = arith.constant 0 : i32
    return %arg0, %c0_i32, %c0_i32_0 : i32, i32, i32
  }
  func.func @transform_1(%arg0: i32) -> (i32, i32) {
    %c0_i32 = arith.constant 0 : i32
    %c0_i32_0 = arith.constant 0 : i32
    %c0_i32_1 = arith.constant 0 : i32
    return %c0_i32, %c0_i32_0 : i32, i32
  }
  func.func @transform_2(%arg0: i32) -> (i32, i32) {
    %c0_i32 = arith.constant 0 : i32
    %c0_i32_0 = arith.constant 0 : i32
    %c0_i32_1 = arith.constant 0 : i32
    return %c0_i32, %c0_i32_0 : i32, i32
  }
  func.func @transform_3(%arg0: i32) -> (i32, i32) {
    %c0_i32 = arith.constant 0 : i32
    %c0_i32_0 = arith.constant 0 : i32
    %c0_i32_1 = arith.constant 0 : i32
    return %c0_i32, %c0_i32_0 : i32, i32
  }
  func.func @transform_4(%arg0: i32) -> (i32, i32, i32) {
    %c0_i32 = arith.constant 0 : i32
    %c0_i32_0 = arith.constant 0 : i32
    %c0_i32_1 = arith.constant 0 : i32
    return %arg0, %c0_i32, %c0_i32_0 : i32, i32, i32
  }
}

</mosaic_0001>

<bundles_post_ra>
// kernel: tpu_custom_call.1
= control target key start
LH: loop header
LB: loop body
LE: loop exit
PB: predicated region body
PF: predicated region fallthrough
CT: control target
= control target key end

     0   :  { %9 = vsyncpa [#allocation3], 0  ;;  %s1916_s0 = inlined_call_operand.hbm [shape: f32[2,16,256], index: 0, kind: input, shape index: {}]   ;;  %s1917_s1 = inlined_call_operand.hbm [shape: f32[144,256], index: 1, kind: input, shape index: {}]   ;;  %s1918_s2 = inlined_call_operand.hbm [shape: bf16[16,144], index: 2, kind: input, shape index: {}]   ;;  %s1919_s3 = inlined_call_operand.hbm [shape: bf16[16,144], index: 3, kind: input, shape index: {}]   ;;  %s1920_s4 = inlined_call_operand.hbm [shape: f32[2,16,256], index: 4, kind: output, shape index: {}]  }
   0x1   :  { %11 = vsyncpa [#allocation3 + $0x1], 0 }
   0x2   :  { %12 = vsyncpa [#allocation6], 0 }
   0x3   :  { %13 = vsyncpa [#allocation9], 0 }
   0x4   :  { %14 = vsyncpa [#allocation4], 0 }
   0x5   :  { %16 = vsyncpa [#allocation4 + $0x1], 0  ;;  %s1211_s15 = smov 0   ;;  %s1213_s16 = smov 0  }
   0x6   :  { %s1215_s17 = smov 0   ;;  %s1217_s18 = smov 0  }
   0x7 LB: > { %s1232_s19 = sadd.s32 4294967295, %s1166_s18   ;;  %s854_s20 = sadd.s32 4294967294, %s1166_s18   ;;  %s1166_s18 = sphi %s1217_s18, %s1962_s18   ;;  %s1162_s17 = sphi %s1215_s17, %s1961_s17   ;;  %s1158_s16 = sphi %s1213_s16, %s1960_s16   ;;  %s1154_s15 = sphi %s1211_s15, %s1959_s15  }
   0x8   : > { %p42_p0 = scmp.ne.s32.totalorder %s1158_s16, %s1154_s15  ;;  %p1921_p1 = scmp.eq.s32.totalorder %s1232_s19, 0 }
   0x9   : > { %p135_p3 = scmp.eq.s32.totalorder %s854_s20, 1  ;;  %p855_p5 = scmp.ge.s32.totalorder %s1166_s18, 1 }
   0xa   : > { %p1241_p4 = por %p1921_p1, %p42_p0  ;;  %p142_p7 = scmp.lt.s32.totalorder %s1166_s18, 3 }
   0xb   : > { %p1246_p6 = por %p135_p3, %p42_p0  ;;  %s1168_s24 = smov [#allocation5]  }
   0xc   : > { %s1930_s21 = scalar_select %p1241_p4, 1, 0 }
   0xd   : > { %s1931_s22 = scalar_select %p1246_p6, 1, 0 }
   0xe   : > { %p1251_p8 = pnand %p855_p5, %p142_p7  ;;  %s154_s25 = sshll.u32 %s1168_s24, 4  ;;  %s1255_s25 = int_to_ptr.vmem [resolvable:$true] %s154_s25 }
   0xf   : > { %s1169_s27 = smov [#allocation7]   ;;  %s978_s5 = scalar_lea.hbm %s1917_s1, 4608 }
  0x10   : > { %s1932_s23 = scalar_select %p1251_p8, 1, 0 }
  0x11   : > { %p898_p9 = pneg %p1251_p8  ;;  %s167_s28 = sshll.u32 %s1169_s27, 4  ;;  %s1266_s28 = int_to_ptr.vmem [resolvable:$true] %s167_s28 }
  0x12   : > { %p979_p12 = scmp.ne.s32.totalorder %s1917_s1, %s978_s5  ;;  %p985_p5 = scmp.lt.u32.totalorder %s978_s5, %s1917_s1 }
  0x13   : > { %p1262_p11 = pnand %p898_p9, %p1921_p1 }
  0x15   : > { %p1276_p13 = pneg %p1262_p11 }
  0x17   : > { %p981_p0 = pnand %p1276_p13, %p979_p12 }
  0x19   : > { %p982_p3 = pneg %p981_p0 }
  0x1b   : > { %p987_p7 = pnand %p985_p5, %p982_p3 }
  0x1d   : > { %990 = shalt.err (!%p987_p7)
}
  0x1e   : > { %s991_s11 = scalar_lea.vmem %s1255_s25, 4608  ;;  %p999_p2 = scmp.lt.s32.totalorder %s1255_s25, %s1255_s25 }
  0x1f   : > { %p992_p9 = scmp.ne.s32.totalorder %s1255_s25, %s991_s11  ;;  %p1000_p6 = scmp.lt.s32.totalorder %s991_s11, %s991_s11 }
  0x21   : > { %p994_p10 = pnand %p992_p9, %p1276_p13  ;;  %p1001_p12 = por %p1000_p6, %p999_p2 }
  0x23   : > { %p995_p1 = pneg %p994_p10 }
  0x25   : > { %p1002_p0 = pnand %p1001_p12, %p995_p1 }
  0x27   : > { %1005 = shalt.err (!%p1002_p0)
}
  0x28   : > { %s1922_s12 = smov 256   ;;  %s1171_s13 = smov 16  }
  0x29   : > { %901 = dma.hbm_to_vmem [thread:$0]  (!%p1262_p11), %s1917_s1, 4608, %s1255_s25, [#allocation6], %s1922_s12, %s1922_s12, %s1171_s13  }
  0x2a   : > { %s1006_s29 = scalar_lea.hbm %s1918_s2, 256 }
  0x2b   : > { %p1007_p1 = scmp.ne.s32.totalorder %s1918_s2, %s1006_s29  ;;  %p1013_p10 = scmp.lt.u32.totalorder %s1006_s29, %s1918_s2 }
  0x2d   : > { %p1009_p2 = pnand %p1007_p1, %p1276_p13 }
  0x2f   : > { %p1010_p6 = pneg %p1009_p2 }
  0x31   : > { %p1015_p3 = pnand %p1013_p10, %p1010_p6 }
  0x33   : > { %1018 = shalt.err (!%p1015_p3)
}
  0x34   : > { %s1019_s25 = scalar_lea.vmem %s1266_s28, 256  ;;  %p1027_p12 = scmp.lt.s32.totalorder %s1266_s28, %s1266_s28 }
  0x35   : > { %p1020_p5 = scmp.ne.s32.totalorder %s1266_s28, %s1019_s25  ;;  %p1028_p0 = scmp.lt.s32.totalorder %s1019_s25, %s1019_s25 }
  0x37   : > { %p1022_p7 = pnand %p1020_p5, %p1276_p13  ;;  %p1029_p1 = por %p1028_p0, %p1027_p12 }
  0x39   : > { %p1023_p9 = pneg %p1022_p7 }
  0x3b   : > { %p1030_p2 = pnand %p1029_p1, %p1023_p9 }
  0x3d   : > { %1033 = shalt.err (!%p1030_p2)
}
  0x3e   : > { %s1172_s9 = smov 128   ;;  %s1173_s10 = smov 8  }
  0x3f   : > { %904 = dma.hbm_to_vmem [thread:$0]  (!%p1262_p11), %s1918_s2, 256, %s1266_s28, [#allocation6], %s1172_s9, %s1172_s9, %s1173_s10  }
  0x40   : > { %s1174_s20 = smov [#allocation8]   ;;  %s1324_s27 = sadd.s32 1, %s1166_s18  }
  0x41   : > { %s180_s24 = sshll.u32 %s1174_s20, 4  ;;  %s1034_s5 = scalar_lea.hbm %s1919_s3, 256  ;;  %s181_s24 = int_to_ptr.vmem [resolvable:$true] %s180_s24 }
  0x42   : > { %p1035_p6 = scmp.ne.s32.totalorder %s1919_s3, %s1034_s5  ;;  %p1041_p5 = scmp.lt.u32.totalorder %s1034_s5, %s1919_s3 }
  0x44   : > { %p1037_p10 = pnand %p1035_p6, %p1276_p13 }
  0x46   : > { %p1038_p3 = pneg %p1037_p10 }
  0x48   : > { %p1043_p7 = pnand %p1041_p5, %p1038_p3 }
  0x4a   : > { %1046 = shalt.err (!%p1043_p7)
}
  0x4b   : > { %s1047_s28 = scalar_lea.vmem %s181_s24, 256  ;;  %p1055_p1 = scmp.lt.s32.totalorder %s181_s24, %s181_s24 }
  0x4c   : > { %p1048_p9 = scmp.ne.s32.totalorder %s181_s24, %s1047_s28  ;;  %p1056_p2 = scmp.lt.s32.totalorder %s1047_s28, %s1047_s28 }
  0x4e   : > { %p1050_p12 = pnand %p1048_p9, %p1276_p13  ;;  %p1057_p4 = por %p1056_p2, %p1055_p1 }
  0x50   : > { %p1051_p0 = pneg %p1050_p12 }
  0x52   : > { %p1058_p8 = pnand %p1057_p4, %p1051_p0 }
  0x54   : > { %1061 = shalt.err (!%p1058_p8)
}
  0x55   : > { %907 = dma.hbm_to_vmem [thread:$0]  (!%p1262_p11), %s1919_s3, 256, %s181_s24, [#allocation9], %s1172_s9, %s1172_s9, %s1173_s10  }
  0x56   : > { %s26_s8 = ssub.s32 %s1166_s18, %s1324_s27  ;;  %s29_s12 = sadd.s32 1, %s1162_s17 }
  0x57   : > { %p27_p4 = scmp.eq.s32.totalorder %s26_s8, 0  ;;  %p36_p8 = scmp.ne.s32.totalorder %s1162_s17, %s1158_s16 }
  0x58   : > { %p37_p13 = scmp.eq.s32.totalorder %s1166_s18, 0  ;;  %p919_p6 = scmp.lt.s32.totalorder %s1166_s18, 2 }
  0x59   : > { %s1352_s26 = scalar_select %p27_p4, %s1162_s17, %s29_s12  }
  0x5a   : > { %p38_p10 = por %p37_p13, %p36_p8  ;;  %p1935_p3 = scmp.eq.s32.totalorder %s1232_s19, 1 }
  0x5b   : > { %s194_s29 = sand.u32 1, %s1162_s17   ;;  %s880_s30 = sshll.u32 %s1166_s18, 9 }
  0x5c   : > { %p1356_p5 = por %p1935_p3, %p36_p8  ;;  %s860_s5 = sshll.u32 %s194_s29, 5 }
  0x5d   : > { %s1365_s9 = scalar_lea.hbm %s1916_s0, %s880_s30  ;;  %s198_s10 = scalar_lea.vmem [#allocation2], %s860_s5 }
  0x5e   : > { %s205_s24 = sshll.u32 %s198_s10, 4  ;;  %p1367_p11 = pnand %p919_p6, %p38_p10  ;;  %s1371_s24 = int_to_ptr.vmem [resolvable:$true] %s205_s24 }
  0x5f   : > { %s1373_s28 = scalar_lea.sflag [#allocation3], %s194_s29  ;;  %s1062_s11 = scalar_lea.hbm %s1365_s9, 512 }
  0x60   : > { %p1063_p7 = scmp.ne.s32.totalorder %s1365_s9, %s1062_s11  ;;  %p1064_p9 = pneg %p1367_p11 }
  0x61   : > { %s1067_s12 = scalar_lea.hbm %s1916_s0, 1024  ;;  %p1068_p1 = scmp.lt.u32.totalorder %s1365_s9, %s1916_s0 }
  0x62   : > { %p1065_p12 = pnand %p1064_p9, %p1063_p7  ;;  %p1069_p2 = scmp.lt.u32.totalorder %s1067_s12, %s1062_s11 }
  0x63   : > { %p1071_p8 = scmp.lt.u32.totalorder %s1062_s11, %s1365_s9 }
  0x64   : > { %p1066_p0 = pneg %p1065_p12  ;;  %p1070_p4 = por %p1069_p2, %p1068_p1 }
  0x66   : > { %p1072_p13 = por %p1071_p8, %p1070_p4 }
  0x68   : > { %p1073_p6 = pnand %p1072_p13, %p1066_p0 }
  0x6a   : > { %1076 = shalt.err (!%p1073_p6)
}
  0x6b   : > { %s1077_s29 = scalar_lea.vmem %s1371_s24, 512  ;;  %s1175_s6 = smov [#allocation2]  }
  0x6c   : > { %p1078_p10 = scmp.ne.s32.totalorder %s1371_s24, %s1077_s29  ;;  %s1082_s7 = sshll.u32 %s1175_s6, 4  ;;  %s1083_s7 = int_to_ptr.vmem [resolvable:$false] %s1082_s7 }
  0x6d   : > { %s1084_s10 = scalar_lea.vmem %s1083_s7, 1024  ;;  %p1085_p12 = scmp.lt.s32.totalorder %s1371_s24, %s1083_s7 }
  0x6e   : > { %p1080_p3 = pnand %p1078_p10, %p1064_p9  ;;  %p1086_p1 = scmp.lt.s32.totalorder %s1084_s10, %s1077_s29 }
  0x70   : > { %p1081_p7 = pneg %p1080_p3  ;;  %p1087_p2 = por %p1086_p1, %p1085_p12 }
  0x72   : > { %p1088_p4 = pnand %p1087_p2, %p1081_p7 }
  0x74   : > { %1091 = shalt.err (!%p1088_p4)
}
  0x75   : > { %s1938_s11 = smov 256   ;;  %p1939_p9 = scmp.ne.s32.totalorder %s1932_s23, 0 }
  0x76   : > { %911 = dma.hbm_to_vmem [thread:$0]  (!%p1367_p11), %s1365_s9, 512, %s1371_s24, %s1373_s28, %s1938_s11, %s1938_s11, %s1171_s13  }
  0x77   : > { %217 = sbr.rel (%p1939_p9) target bundleno = 956 (0x3bc), region = 36 }
  0x7e   : > { %s1407_s14 = sand.u32 1, %s1158_s16   ;;  %p1940_p0 = scmp.ne.s32.totalorder %s1930_s21, 0 }
  0x7f   : > { %s864_s8 = sshll.u32 %s1407_s14, 5  ;;  %s220_s12 = scalar_lea.sflag [#allocation3], %s1407_s14 }
  0x80   : > { %s223_s25 = scalar_lea.vmem [#allocation2], %s864_s8 }
  0x81   : > { %1137 = dma.done.wait (%p1940_p0), %s220_s12, 512  }
  0x82   : > { %1139 = vsyncadd (%p1940_p0), %s220_s12, 4294966784  ;;  %p1941_p11 = scmp.eq.s32.totalorder %s1232_s19, 0 }
  0x84   : > { %1141 = dma.done.wait (%p1941_p11), [#allocation6], 4864   ;;  %p1942_p8 = pmov %p1941_p11 }
  0x86   : > { %1143 = vsyncadd (%p1942_p8), [#allocation6], 4294962432  ;;  %p1943_p13 = pmov %p1942_p8 }
  0x87   : > { %p1944_p6 = pmov %p1942_p8 }
  0x88   : > { %1145 = dma.done.wait (%p1943_p13), [#allocation9], 256  }
  0x89   : > { %1147 = vsyncadd (%p1944_p6), [#allocation9], 4294967040  ;;  %v1425_v0 = vld [vmem:[%s223_s25 + $0x8] sm:$0xff]  ;;  %v1427_v1 = vld [vmem:[%s223_s25] sm:$0xff]  ;;  %s1176_s23 = smov 17   ;;  %s1177_s21 = smov 16   ;;  %v311_v5 = vlaneseq }
  0x8a   : > { %1945 = vst [vmem:[#allocation15_spill] sm:$0xff] %v1425_v0  ;;  %1946 = vst [vmem:[#allocation16_spill] sm:$0xff] %v1427_v1  ;;  %307 = vrot.lane.b32.xlu1 %v1425_v0, %s1176_s23  ;;  %303 = vrot.lane.b32.xlu0 %v1427_v1, %s1176_s23  ;;  %v1433_v2 = vld [vmem:[%s223_s25 + $0x18] sm:$0xff]  ;;  %v1435_v3 = vld [vmem:[%s223_s25 + $0x10] sm:$0xff]  ;;  %s1178_s13 = smov 15   ;;  %s1179_s9 = smov 1  }
  0x8b   : > { %1947 = vst [vmem:[#allocation17_spill] sm:$0xff] %v1433_v2  ;;  %1948 = vst [vmem:[#allocation18_spill] sm:$0xff] %v1435_v3  ;;  %s1180_s24 = smov 127   ;;  %s1181_s28 = smov 113   ;;  %v974_v4 = vld [vmem:[#allocation7 + $0x4] ss:$8 sps:$4 sm:$0xff]  }
  0x8c   : > { %s1182_s30 = smov 112   ;;  %vm472_vm0 = vcmask 130048   ;;  %s1183_s5 = smov 111   ;;  %v1498_v6 = vand.u32 127, %v311_v5  ;;  %v1501_v9 = vld [vmem:[#allocation5] sm:$0xff]  ;;  %v1507_v12 = vld [vmem:[#allocation5 + $0x10] sm:$0xff] }
  0x8d   : > { %871 = vmatprep.mubr.msk.bf16.mxu0 %vm472_vm0, %v974_v4  ;;  %v1509_v13 = vld [vmem:[#allocation5 + $0x8] sm:$0xff]  ;;  %v1511_v14 = vld [vmem:[#allocation5 + $0x18] sm:$0xff]  ;;  %v1521_v27 = vld [vmem:[#allocation5 + $0x30] sm:$0xff]  ;;  %s259_s29 = scalar_lea.vmem [#allocation10], %s864_s8  ;;  %s881_s7 = sshll.u32 %s1232_s19, 9 }
  0x8e   : > { %309 = vrot.lane.b32.xlu1 %v1433_v2, %s1176_s23  ;;  %305 = vrot.lane.b32.xlu0 %v1435_v3, %s1176_s23  ;;  %vm313_vm1 = vcmp.lt.s32.totalorder %v1498_v6, 17  ;;  %vm326_vm2 = vcmp.lt.s32.totalorder %v1498_v6, 16  ;;  %v1524_v28 = vld [vmem:[#allocation5 + $0x38] sm:$0xff]  ;;  %v1526_v29 = vld [vmem:[#allocation5 + $0x20] sm:$0xff]  ;;  %v1528_v30 = vld [vmem:[#allocation5 + $0x28] sm:$0xff]  ;;  %vm339_vm3 = vcmp.lt.s32.totalorder %v1498_v6, 15  ;;  %s1871_s8 = scalar_lea.hbm %s1920_s4, %s881_s7 }
  0x8f   : > { %v1542_v45 = vld [vmem:[#allocation5 + $0x50] sm:$0xff]  ;;  %v1545_v46 = vld [vmem:[#allocation5 + $0x58] sm:$0xff]  ;;  %v1547_v47 = vld [vmem:[#allocation5 + $0x40] sm:$0xff]  ;;  %vm352_vm4 = vcmp.lt.s32.totalorder %v1498_v6, 1  ;;  %vm365_vm5 = vcmp.lt.s32.totalorder %v1498_v6, 127  ;;  %vm378_vm6 = vcmp.lt.s32.totalorder %v1498_v6, 113 }
  0x90   : > { %v1549_v48 = vld [vmem:[#allocation5 + $0x48] sm:$0xff]  ;;  %v1565_v4 = vld [vmem:[#allocation5 + $0x98] sm:$0xff]  ;;  %v1567_v5 = vld [vmem:[#allocation5 + $0x70] sm:$0xff]  ;;  %vm391_vm7 = vcmp.lt.s32.totalorder %v1498_v6, 112  ;;  %vm404_vm8 = vcmp.lt.s32.totalorder %v1498_v6, 111  ;;  %s752_s6 = sshll.u32 %s259_s29, 4  ;;  %s1866_s6 = int_to_ptr.vmem [resolvable:$true] %s752_s6 }
  0x91   : > { %v1563_v63 = vld [vmem:[#allocation5 + $0x88] sm:$0xff]  ;;  %s739_s19 = scalar_lea.sflag [#allocation4], %s1407_s14  ;;  %s1092_s12 = scalar_lea.vmem %s1866_s6, 512 }
  0x92   : > { %320 = vrot.lane.b32.xlu1 %v1435_v3, %s1177_s21  ;;  %318 = vrot.lane.b32.xlu0 %v1427_v1, %s1177_s21  ;;  %p1093_p10 = scmp.ne.s32.totalorder %s1866_s6, %s1092_s12  ;;  %s1184_s25 = smov [#allocation10]  }
  0x94   : > { %p1094_p3 = pnand %p1093_p10, %p1356_p5 }
  0x96   : > { %324 = vrot.lane.b32.xlu1 %v1433_v2, %s1177_s21  ;;  %322 = vrot.lane.b32.xlu0 %v1425_v0, %s1177_s21  ;;  %p1095_p7 = pneg %p1094_p3 }
  0x9a   : > { %333 = vrot.lane.b32.xlu1 %v1435_v3, %s1178_s13  ;;  %331 = vrot.lane.b32.xlu0 %v1427_v1, %s1178_s13 }
  0x9e   : > { %337 = vrot.lane.b32.xlu1 %v1433_v2, %s1178_s13  ;;  %335 = vrot.lane.b32.xlu0 %v1425_v0, %s1178_s13 }
  0xa2   : > { %346 = vrot.lane.b32.xlu1 %v1435_v3, %s1179_s9  ;;  %344 = vrot.lane.b32.xlu0 %v1427_v1, %s1179_s9 }
  0xa6   : > { %350 = vrot.lane.b32.xlu1 %v1433_v2, %s1179_s9  ;;  %348 = vrot.lane.b32.xlu0 %v1425_v0, %s1179_s9 }
  0xaa   : > { %359 = vrot.lane.b32.xlu1 %v1435_v3, %s1180_s24  ;;  %357 = vrot.lane.b32.xlu0 %v1427_v1, %s1180_s24 }
  0xae   : > { %363 = vrot.lane.b32.xlu1 %v1433_v2, %s1180_s24  ;;  %361 = vrot.lane.b32.xlu0 %v1425_v0, %s1180_s24 }
  0xb2   : > { %372 = vrot.lane.b32.xlu1 %v1435_v3, %s1181_s28  ;;  %370 = vrot.lane.b32.xlu0 %v1427_v1, %s1181_s28 }
  0xb6   : > { %376 = vrot.lane.b32.xlu1 %v1433_v2, %s1181_s28  ;;  %374 = vrot.lane.b32.xlu0 %v1425_v0, %s1181_s28 }
  0xba   : > { %385 = vrot.lane.b32.xlu1 %v1435_v3, %s1182_s30  ;;  %383 = vrot.lane.b32.xlu0 %v1427_v1, %s1182_s30 }
  0xbe   : > { %389 = vrot.lane.b32.xlu1 %v1433_v2, %s1182_s30  ;;  %387 = vrot.lane.b32.xlu0 %v1425_v0, %s1182_s30 }
  0xc2   : > { %398 = vrot.lane.b32.xlu1 %v1435_v3, %s1183_s5  ;;  %396 = vrot.lane.b32.xlu0 %v1427_v1, %s1183_s5 }
  0xc6   : > { %402 = vrot.lane.b32.xlu1 %v1433_v2, %s1183_s5  ;;  %400 = vrot.lane.b32.xlu0 %v1425_v0, %s1183_s5 }
  0xfc   : > { %v308_v7 = vpop.permute.xlu1 %307  ;;  %v304_v8 = vpop.permute.xlu0 %303 }
  0xfd   : > { %v314_v10 = vsel %vm313_vm1, %v304_v8, %v308_v7  ;;  %v316_v11 = vsel %vm313_vm1, %v308_v7, %v304_v8  ;;  %v1570_v7 = vld [vmem:[#allocation5 + $0x78] sm:$0xff]  ;;  %v1572_v8 = vld [vmem:[#allocation5 + $0x60] sm:$0xff] }
  0xfe   : > { %v409_v19 = vmul.f32 %v316_v11, %v1501_v9  ;;  %v410_v21 = vmul.f32 %v314_v10, %v1509_v13  ;;  %v1574_v10 = vld [vmem:[#allocation5 + $0x68] sm:$0xff] }
 0x100   : > { %v310_v15 = vpop.permute.xlu1 %309  ;;  %v306_v16 = vpop.permute.xlu0 %305 }
 0x101   : > { %v315_v17 = vsel %vm313_vm1, %v306_v16, %v310_v15  ;;  %v317_v18 = vsel %vm313_vm1, %v310_v15, %v306_v16  ;;  %v426_v16 = vmul.f32 %v1563_v63, %v1425_v0 }
 0x102   : > { %v411_v20 = vmul.f32 %v317_v18, %v1507_v12  ;;  %v412_v22 = vmul.f32 %v315_v17, %v1511_v14  ;;  %v428_v17 = vmul.f32 %v1565_v4, %v1433_v2  ;;  %v1580_v18 = vld [vmem:[#allocation5 + $0x80] sm:$0xff] }
 0x104   : > { %v321_v23 = vpop.permute.xlu1 %320  ;;  %v319_v24 = vpop.permute.xlu0 %318  ;;  %v446_v25 = vpack.c.bf16 %v412_v22, %v410_v21  ;;  %v445_v26 = vpack.c.bf16 %v411_v20, %v409_v19  ;;  %v1582_v19 = vld [vmem:[#allocation5 + $0x90] sm:$0xff] }
 0x106   : > { %476 = vmatprep.subr.bf16.mxu0 %v446_v25 }
 0x107   : > { %477 = vmatpush1.bf16.msra.mxu0 %v445_v26 }
 0x108   : > { %v325_v31 = vpop.permute.xlu1 %324  ;;  %v323_v32 = vpop.permute.xlu0 %322 }
 0x109   : > { %v328_v33 = vsel %vm326_vm2, %v321_v23, %v325_v31  ;;  %v330_v34 = vsel %vm326_vm2, %v325_v31, %v321_v23  ;;  %v327_v35 = vsel %vm326_vm2, %v319_v24, %v323_v32  ;;  %v329_v36 = vsel %vm326_vm2, %v323_v32, %v319_v24 }
 0x10a   : > { %v415_v37 = vmul.f32 %v330_v34, %v1521_v27  ;;  %v416_v38 = vmul.f32 %v328_v33, %v1524_v28  ;;  %v413_v39 = vmul.f32 %v329_v36, %v1526_v29  ;;  %v414_v40 = vmul.f32 %v327_v35, %v1528_v30 }
 0x10b   : > { %v425_v32 = vmul.f32 %v1580_v18, %v1427_v1  ;;  %v427_v33 = vmul.f32 %v1582_v19, %v1435_v3 }
 0x10c   : > { %v334_v41 = vpop.permute.xlu1 %333  ;;  %v332_v42 = vpop.permute.xlu0 %331  ;;  %v448_v43 = vpack.c.bf16 %v416_v38, %v414_v40  ;;  %v447_v44 = vpack.c.bf16 %v415_v37, %v413_v39  ;;  %v454_v38 = vpack.c.bf16 %v428_v17, %v426_v16  ;;  %v1600_v39 = vld [vmem:[#allocation5 + $0xb0] sm:$0xff]  ;;  %v1603_v40 = vld [vmem:[#allocation5 + $0xb8] sm:$0xff]  ;;  %v1628_v16 = vld [vmem:[#allocation5 + $0xc8] sm:$0xff] }
 0x10e   : > { %478 = vmatprep.subr.bf16.mxu0 %v448_v43  ;;  %v453_v43 = vpack.c.bf16 %v427_v33, %v425_v32 }
 0x10f   : > { %479 = vmatpush1.bf16.msra.mxu0 %v447_v44 }
 0x110   : > { %v338_v49 = vpop.permute.xlu1 %337  ;;  %v336_v50 = vpop.permute.xlu0 %335 }
 0x111   : > { %v341_v51 = vsel %vm339_vm3, %v334_v41, %v338_v49  ;;  %v343_v52 = vsel %vm339_vm3, %v338_v49, %v334_v41  ;;  %v340_v53 = vsel %vm339_vm3, %v332_v42, %v336_v50  ;;  %v342_v54 = vsel %vm339_vm3, %v336_v50, %v332_v42  ;;  %v1605_v41 = vld [vmem:[#allocation5 + $0xa0] sm:$0xff]  ;;  %v1607_v42 = vld [vmem:[#allocation5 + $0xa8] sm:$0xff] }
 0x112   : > { %v419_v55 = vmul.f32 %v343_v52, %v1542_v45  ;;  %v420_v56 = vmul.f32 %v341_v51, %v1545_v46  ;;  %v417_v57 = vmul.f32 %v342_v54, %v1547_v47  ;;  %v418_v58 = vmul.f32 %v340_v53, %v1549_v48 }
 0x114   : > { %v347_v59 = vpop.permute.xlu1 %346  ;;  %v345_v60 = vpop.permute.xlu0 %344  ;;  %v450_v61 = vpack.c.bf16 %v420_v56, %v418_v58  ;;  %v449_v62 = vpack.c.bf16 %v419_v55, %v417_v57 }
 0x116   : > { %480 = vmatprep.subr.bf16.mxu0 %v450_v61 }
 0x117   : > { %481 = vmatpush1.bf16.msra.mxu0 %v449_v62  ;;  %v1621_v62 = vld [vmem:[#allocation5 + $0xd0] sm:$0xff] }
 0x118   : > { %v351_v11 = vpop.permute.xlu1 %350  ;;  %v349_v15 = vpop.permute.xlu0 %348 }
 0x119   : > { %v354_v20 = vsel %vm352_vm4, %v347_v59, %v351_v11  ;;  %v356_v21 = vsel %vm352_vm4, %v351_v11, %v347_v59  ;;  %v353_v22 = vsel %vm352_vm4, %v345_v60, %v349_v15  ;;  %v355_v23 = vsel %vm352_vm4, %v349_v15, %v345_v60  ;;  %v1624_v11 = vld [vmem:[#allocation5 + $0xd8] sm:$0xff]  ;;  %v1626_v15 = vld [vmem:[#allocation5 + $0xc0] sm:$0xff] }
 0x11a   : > { %v423_v24 = vmul.f32 %v356_v21, %v1567_v5  ;;  %v424_v25 = vmul.f32 %v354_v20, %v1570_v7  ;;  %v421_v26 = vmul.f32 %v355_v23, %v1572_v8  ;;  %v422_v31 = vmul.f32 %v353_v22, %v1574_v10 }
 0x11c   : > { %v360_v34 = vpop.permute.xlu1 %359  ;;  %v358_v35 = vpop.permute.xlu0 %357  ;;  %v452_v36 = vpack.c.bf16 %v424_v25, %v422_v31  ;;  %v451_v37 = vpack.c.bf16 %v423_v24, %v421_v26 }
 0x11e   : > { %482 = vmatprep.subr.bf16.mxu0 %v452_v36 }
 0x11f   : > { %483 = vmatpush1.bf16.msra.mxu0 %v451_v37  ;;  %v1642_v37 = vld [vmem:[#allocation5 + $0xf0] sm:$0xff] }
 0x120   : > { %v364_v44 = vpop.permute.xlu1 %363  ;;  %v362_v49 = vpop.permute.xlu0 %361  ;;  %484 = vmatprep.subr.bf16.mxu0 %v454_v38  ;;  %v1645_v38 = vld [vmem:[#allocation5 + $0xf8] sm:$0xff] }
 0x121   : > { %v367_v50 = vsel %vm365_vm5, %v360_v34, %v364_v44  ;;  %v369_v51 = vsel %vm365_vm5, %v364_v44, %v360_v34  ;;  %v366_v52 = vsel %vm365_vm5, %v358_v35, %v362_v49  ;;  %v368_v53 = vsel %vm365_vm5, %v362_v49, %v358_v35  ;;  %v1649_v44 = vld [vmem:[#allocation5 + $0xe8] sm:$0xff] }
 0x122   : > { %v431_v54 = vmul.f32 %v367_v50, %v1600_v39  ;;  %v432_v55 = vmul.f32 %v369_v51, %v1603_v40  ;;  %v429_v56 = vmul.f32 %v366_v52, %v1605_v41  ;;  %v430_v57 = vmul.f32 %v368_v53, %v1607_v42 }
 0x123   : > { %485 = vmatpush1.bf16.msra.mxu0 %v453_v43  ;;  %v1647_v43 = vld [vmem:[#allocation5 + $0xe0] sm:$0xff] }
 0x124   : > { %v373_v58 = vpop.permute.xlu1 %372  ;;  %v371_v59 = vpop.permute.xlu0 %370  ;;  %v456_v60 = vpack.c.bf16 %v432_v55, %v430_v57  ;;  %v455_v61 = vpack.c.bf16 %v431_v54, %v429_v56 }
 0x126   : > { %486 = vmatprep.subr.bf16.mxu0 %v456_v60 }
 0x127   : > { %487 = vmatpush1.bf16.msra.mxu0 %v455_v61 }
 0x128   : > { %v377_v17 = vpop.permute.xlu1 %376  ;;  %v375_v20 = vpop.permute.xlu0 %374 }
 0x129   : > { %v380_v21 = vsel %vm378_vm6, %v373_v58, %v377_v17  ;;  %v382_v22 = vsel %vm378_vm6, %v377_v17, %v373_v58  ;;  %v379_v23 = vsel %vm378_vm6, %v371_v59, %v375_v20  ;;  %v381_v24 = vsel %vm378_vm6, %v375_v20, %v371_v59  ;;  %v1663_v20 = vld [vmem:[#allocation5 + $0x110] sm:$0xff] }
 0x12a   : > { %v435_v25 = vmul.f32 %v380_v21, %v1621_v62  ;;  %v436_v26 = vmul.f32 %v382_v22, %v1624_v11  ;;  %v433_v31 = vmul.f32 %v379_v23, %v1626_v15  ;;  %v434_v32 = vmul.f32 %v381_v24, %v1628_v16  ;;  %v1666_v21 = vld [vmem:[#allocation5 + $0x118] sm:$0xff]  ;;  %v1668_v22 = vld [vmem:[#allocation5 + $0x100] sm:$0xff]  ;;  %v1670_v23 = vld [vmem:[#allocation5 + $0x108] sm:$0xff] }
 0x12b   : > { %1949 = vst [vmem:[#allocation19_spill] sm:$0xff] %v1666_v21 }
 0x12c   : > { %v386_v33 = vpop.permute.xlu1 %385  ;;  %v384_v34 = vpop.permute.xlu0 %383  ;;  %v458_v35 = vpack.c.bf16 %v436_v26, %v434_v32  ;;  %v457_v36 = vpack.c.bf16 %v435_v25, %v433_v31 }
 0x12e   : > { %488 = vmatprep.subr.bf16.mxu0 %v458_v35 }
 0x12f   : > { %489 = vmatpush1.bf16.msra.mxu0 %v457_v36 }
 0x130   : > { %v390_v49 = vpop.permute.xlu1 %389  ;;  %v388_v50 = vpop.permute.xlu0 %387 }
 0x131   : > { %v393_v51 = vsel %vm391_vm7, %v386_v33, %v390_v49  ;;  %v395_v52 = vsel %vm391_vm7, %v390_v49, %v386_v33  ;;  %v392_v53 = vsel %vm391_vm7, %v384_v34, %v388_v50  ;;  %v394_v54 = vsel %vm391_vm7, %v388_v50, %v384_v34 }
 0x132   : > { %v439_v55 = vmul.f32 %v393_v51, %v1642_v37  ;;  %v440_v56 = vmul.f32 %v395_v52, %v1645_v38  ;;  %v437_v57 = vmul.f32 %v392_v53, %v1647_v43  ;;  %v438_v58 = vmul.f32 %v394_v54, %v1649_v44  ;;  %v972_v52 = vld [vmem:[#allocation7] ss:$8 sps:$4 sm:$0xff]  }
 0x134   : > { %v399_v59 = vpop.permute.xlu1 %398  ;;  %v397_v60 = vpop.permute.xlu0 %396  ;;  %v460_v61 = vpack.c.bf16 %v440_v56, %v438_v58  ;;  %v459_v17 = vpack.c.bf16 %v439_v55, %v437_v57 }
 0x136   : > { %490 = vmatprep.subr.bf16.mxu0 %v460_v61 }
 0x137   : > { %491 = vmatpush1.bf16.msra.mxu0 %v459_v17 }
 0x138   : > { %v403_v24 = vpop.permute.xlu1 %402  ;;  %v401_v25 = vpop.permute.xlu0 %400 }
 0x139   : > { %v406_v26 = vsel %vm404_vm8, %v399_v59, %v403_v24  ;;  %v408_v31 = vsel %vm404_vm8, %v403_v24, %v399_v59  ;;  %v405_v32 = vsel %vm404_vm8, %v397_v60, %v401_v25  ;;  %v407_v33 = vsel %vm404_vm8, %v401_v25, %v397_v60 }
 0x13a   : > { %v443_v34 = vmul.f32 %v406_v26, %v1663_v20  ;;  %v444_v35 = vmul.f32 %v408_v31, %v1666_v21  ;;  %v441_v36 = vmul.f32 %v405_v32, %v1668_v22  ;;  %v442_v49 = vmul.f32 %v407_v33, %v1670_v23 }
 0x13c   : > { %v462_v50 = vpack.c.bf16 %v444_v35, %v442_v49  ;;  %v461_v51 = vpack.c.bf16 %v443_v34, %v441_v36 }
 0x13e   : > { %492 = vmatprep.subr.bf16.mxu0 %v462_v50 }
 0x13f   : > { %493 = vmatpush1.bf16.msra.mxu0 %v461_v51 }
 0x142   : > { %509 = vmatmul.mubr.bf16.vlgmr.msra.gmra.mrb[0].mxu0 %v972_v52 }
 0x215   : > { %v510_v53 = vpop.f32.mrb[0].mxu0 }
 0x216   : > { %v519_v54 = vmax.f32 %v510_v53, 0.0  ;;  %v512_v55 = vpop.f32.mrb[1].mxu0 }
 0x217   : > { %v520_v56 = vmax.f32 %v512_v55, 0.0  ;;  %v514_v57 = vpop.f32.mrb[2].mxu0 }
 0x218   : > { %v521_v58 = vmax.f32 %v514_v57, 0.0  ;;  %525 = vrot.lane.b32.xlu0 %v519_v54, %s1176_s23  ;;  %v516_v59 = vpop.f32.mrb[3].mxu0  ;;  %v1687_v61 = vmul.f32 %v519_v54, %v1580_v18 }
 0x219   : > { %v522_v60 = vmax.f32 %v516_v59, 0.0  ;;  %v1693_v24 = vmul.f32 %v520_v56, %v1563_v63  ;;  %v977_v63 = vld [vmem:[#allocation8 + $0x4] ss:$8 sps:$4 sm:$0xff]  }
 0x21a   : > { %527 = vrot.lane.b32.xlu1 %v521_v58, %s1176_s23  ;;  %v1690_v17 = vmul.f32 %v521_v58, %v1582_v19  ;;  %874 = vmatprep.mubr.msk.bf16.mxu1 %vm472_vm0, %v977_v63 }
 0x21b   : > { %v1696_v25 = vmul.f32 %v522_v60, %v1565_v4 }
 0x21c   : > { %537 = vrot.lane.b32.xlu0 %v519_v54, %s1177_s21 }
 0x21e   : > { %539 = vrot.lane.b32.xlu1 %v521_v58, %s1177_s21 }
 0x220   : > { %549 = vrot.lane.b32.xlu0 %v519_v54, %s1178_s13 }
 0x222   : > { %551 = vrot.lane.b32.xlu1 %v521_v58, %s1178_s13 }
 0x224   : > { %561 = vrot.lane.b32.xlu0 %v519_v54, %s1179_s9 }
 0x226   : > { %563 = vrot.lane.b32.xlu1 %v521_v58, %s1179_s9 }
 0x228   : > { %573 = vrot.lane.b32.xlu0 %v519_v54, %s1180_s24 }
 0x22a   : > { %575 = vrot.lane.b32.xlu1 %v521_v58, %s1180_s24 }
 0x22c   : > { %585 = vrot.lane.b32.xlu0 %v519_v54, %s1181_s28 }
 0x22e   : > { %587 = vrot.lane.b32.xlu1 %v521_v58, %s1181_s28 }
 0x230   : > { %597 = vrot.lane.b32.xlu0 %v519_v54, %s1182_s30 }
 0x232   : > { %599 = vrot.lane.b32.xlu1 %v521_v58, %s1182_s30 }
 0x234   : > { %529 = vrot.lane.b32.xlu0 %v520_v56, %s1176_s23 }
 0x236   : > { %531 = vrot.lane.b32.xlu1 %v522_v60, %s1176_s23  ;;  %s1096_s23 = sshll.u32 %s1184_s25, 4  ;;  %s1097_s23 = int_to_ptr.vmem [resolvable:$false] %s1096_s23 }
 0x237   : > { %p1099_p12 = scmp.lt.s32.totalorder %s1866_s6, %s1097_s23 }
 0x238   : > { %541 = vrot.lane.b32.xlu0 %v520_v56, %s1177_s21 }
 0x23a   : > { %543 = vrot.lane.b32.xlu1 %v522_v60, %s1177_s21 }
 0x23c   : > { %553 = vrot.lane.b32.xlu0 %v520_v56, %s1178_s13 }
 0x23e   : > { %555 = vrot.lane.b32.xlu1 %v522_v60, %s1178_s13  ;;  %s1098_s13 = scalar_lea.vmem %s1097_s23, 1024 }
 0x23f   : > { %p1100_p1 = scmp.lt.s32.totalorder %s1098_s13, %s1092_s12 }
 0x240   : > { %565 = vrot.lane.b32.xlu0 %v520_v56, %s1179_s9 }
 0x241   : > { %p1101_p2 = por %p1100_p1, %p1099_p12 }
 0x242   : > { %567 = vrot.lane.b32.xlu1 %v522_v60, %s1179_s9 }
 0x243   : > { %p1102_p4 = pnand %p1101_p2, %p1095_p7 }
 0x244   : > { %609 = vrot.lane.b32.xlu0 %v519_v54, %s1183_s5 }
 0x246   : > { %611 = vrot.lane.b32.xlu1 %v521_v58, %s1183_s5 }
 0x248   : > { %577 = vrot.lane.b32.xlu0 %v520_v56, %s1180_s24 }
 0x24a   : > { %579 = vrot.lane.b32.xlu1 %v522_v60, %s1180_s24 }
 0x24c   : > { %589 = vrot.lane.b32.xlu0 %v520_v56, %s1181_s28 }
 0x24e   : > { %591 = vrot.lane.b32.xlu1 %v522_v60, %s1181_s28 }
 0x250   : > { %601 = vrot.lane.b32.xlu0 %v520_v56, %s1182_s30 }
 0x252   : > { %603 = vrot.lane.b32.xlu1 %v522_v60, %s1182_s30 }
 0x254   : > { %613 = vrot.lane.b32.xlu0 %v520_v56, %s1183_s5 }
 0x256   : > { %615 = vrot.lane.b32.xlu1 %v522_v60, %s1183_s5 }
 0x28a   : > { %v526_v4 = vpop.permute.xlu0 %525 }
 0x28c   : > { %v528_v18 = vpop.permute.xlu1 %527 }
 0x28e   : > { %v538_v19 = vpop.permute.xlu0 %537 }
 0x290   : > { %v540_v32 = vpop.permute.xlu1 %539 }
 0x292   : > { %v550_v33 = vpop.permute.xlu0 %549 }
 0x294   : > { %v552_v34 = vpop.permute.xlu1 %551 }
 0x296   : > { %v562_v35 = vpop.permute.xlu0 %561 }
 0x298   : > { %v564_v36 = vpop.permute.xlu1 %563 }
 0x29a   : > { %v1733_v49 = vpop.permute.xlu0 %573 }
 0x29c   : > { %v1735_v50 = vpop.permute.xlu1 %575 }
 0x29e   : > { %v1737_v51 = vpop.permute.xlu0 %585 }
 0x2a0   : > { %v1739_v52 = vpop.permute.xlu1 %587 }
 0x2a2   : > { %v1741_v53 = vpop.permute.xlu0 %597 }
 0x2a4   : > { %v1743_v54 = vpop.permute.xlu1 %599 }
 0x2a6   : > { %v530_v55 = vpop.permute.xlu0 %529 }
 0x2a7   : > { %v533_v56 = vsel %vm313_vm1, %v526_v4, %v530_v55  ;;  %v535_v57 = vsel %vm313_vm1, %v530_v55, %v526_v4 }
 0x2a8   : > { %v532_v58 = vpop.permute.xlu1 %531  ;;  %v621_v63 = vmul.f32 %v535_v57, %v1501_v9  ;;  %v622_v2 = vmul.f32 %v533_v56, %v1509_v13 }
 0x2a9   : > { %v534_v59 = vsel %vm313_vm1, %v528_v18, %v532_v58  ;;  %v536_v60 = vsel %vm313_vm1, %v532_v58, %v528_v18 }
 0x2aa   : > { %v623_v26 = vmul.f32 %v536_v60, %v1507_v12  ;;  %v542_v31 = vpop.permute.xlu0 %541  ;;  %v624_v3 = vmul.f32 %v534_v59, %v1511_v14 }
 0x2ab   : > { %v545_v0 = vsel %vm326_vm2, %v538_v19, %v542_v31  ;;  %v547_v4 = vsel %vm326_vm2, %v542_v31, %v538_v19 }
 0x2ac   : > { %v544_v55 = vpop.permute.xlu1 %543  ;;  %v658_v1 = vpack.c.bf16 %v624_v3, %v622_v2  ;;  %v657_v21 = vpack.c.bf16 %v623_v26, %v621_v63  ;;  %v625_v12 = vmul.f32 %v547_v4, %v1526_v29  ;;  %v626_v13 = vmul.f32 %v545_v0, %v1528_v30 }
 0x2ad   : > { %v546_v18 = vsel %vm326_vm2, %v540_v32, %v544_v55  ;;  %v548_v9 = vsel %vm326_vm2, %v544_v55, %v540_v32 }
 0x2ae   : > { %v627_v14 = vmul.f32 %v548_v9, %v1521_v27  ;;  %v628_v56 = vmul.f32 %v546_v18, %v1524_v28  ;;  %v554_v57 = vpop.permute.xlu0 %553  ;;  %687 = vmatprep.subr.bf16.mxu1 %v658_v1 }
 0x2af   : > { %v557_v2 = vsel %vm339_vm3, %v550_v33, %v554_v57  ;;  %v559_v3 = vsel %vm339_vm3, %v554_v57, %v550_v33  ;;  %688 = vmatpush1.bf16.msra.mxu1 %v657_v21 }
 0x2b0   : > { %v556_v26 = vpop.permute.xlu1 %555  ;;  %v660_v31 = vpack.c.bf16 %v628_v56, %v626_v13  ;;  %v659_v19 = vpack.c.bf16 %v627_v14, %v625_v12  ;;  %v629_v27 = vmul.f32 %v559_v3, %v1547_v47  ;;  %v630_v1 = vmul.f32 %v557_v2, %v1549_v48 }
 0x2b1   : > { %v558_v29 = vsel %vm339_vm3, %v552_v34, %v556_v26  ;;  %v560_v0 = vsel %vm339_vm3, %v556_v26, %v552_v34 }
 0x2b2   : > { %v631_v28 = vmul.f32 %v560_v0, %v1542_v45  ;;  %v632_v30 = vmul.f32 %v558_v29, %v1545_v46  ;;  %v566_v32 = vpop.permute.xlu0 %565  ;;  %689 = vmatprep.subr.bf16.mxu1 %v660_v31 }
 0x2b3   : > { %v569_v21 = vsel %vm352_vm4, %v562_v35, %v566_v32  ;;  %v571_v33 = vsel %vm352_vm4, %v566_v32, %v562_v35  ;;  %690 = vmatpush1.bf16.msra.mxu1 %v659_v19 }
 0x2b4   : > { %v568_v58 = vpop.permute.xlu1 %567  ;;  %v662_v59 = vpack.c.bf16 %v632_v30, %v630_v1  ;;  %v661_v34 = vpack.c.bf16 %v631_v28, %v629_v27  ;;  %v633_v46 = vmul.f32 %v571_v33, %v1572_v8  ;;  %v634_v48 = vmul.f32 %v569_v21, %v1574_v10 }
 0x2b5   : > { %v570_v47 = vsel %vm352_vm4, %v564_v36, %v568_v58  ;;  %v572_v45 = vsel %vm352_vm4, %v568_v58, %v564_v36  ;;  %v1952_v58 = vld [vmem:[#allocation19_spill] sm:$0xff] }
 0x2b6   : > { %v635_v60 = vmul.f32 %v572_v45, %v1567_v5  ;;  %v636_v63 = vmul.f32 %v570_v47, %v1570_v7  ;;  %v610_v4 = vpop.permute.xlu0 %609  ;;  %691 = vmatprep.subr.bf16.mxu1 %v662_v59  ;;  %v1950_v7 = vpack.c.bf16 %v1696_v25, %v1693_v24  ;;  %v975_v45 = vld [vmem:[#allocation8] ss:$8 sps:$4 sm:$0xff]  }
 0x2b7   : > { %692 = vmatpush1.bf16.msra.mxu1 %v661_v34 }
 0x2b8   : > { %v612_v35 = vpop.permute.xlu1 %611  ;;  %v664_v55 = vpack.c.bf16 %v636_v63, %v634_v48  ;;  %v663_v18 = vpack.c.bf16 %v635_v60, %v633_v46  ;;  %v1953_v46 = vld [vmem:[#allocation16_spill] sm:$0xff] }
 0x2ba   : > { %v578_v9 = vpop.permute.xlu0 %577  ;;  %693 = vmatprep.subr.bf16.mxu1 %v664_v55 }
 0x2bb   : > { %v581_v36 = vsel %vm365_vm5, %v1733_v49, %v578_v9  ;;  %v583_v8 = vsel %vm365_vm5, %v578_v9, %v1733_v49  ;;  %694 = vmatpush1.bf16.msra.mxu1 %v663_v18  ;;  %v1956_v9 = vld [vmem:[#allocation17_spill] sm:$0xff] }
 0x2bc   : > { %v580_v5 = vpop.permute.xlu1 %579  ;;  %695 = vmatprep.subr.bf16.mxu1 %v1950_v7  ;;  %v641_v13 = vmul.f32 %v581_v36, %v1605_v41  ;;  %v642_v14 = vmul.f32 %v583_v8, %v1607_v42 }
 0x2bd   : > { %v582_v10 = vsel %vm365_vm5, %v1735_v50, %v580_v5  ;;  %v584_v12 = vsel %vm365_vm5, %v580_v5, %v1735_v50  ;;  %v1951_v50 = vpack.c.bf16 %v1690_v17, %v1687_v61 }
 0x2be   : > { %v643_v49 = vmul.f32 %v582_v10, %v1600_v39  ;;  %v644_v56 = vmul.f32 %v584_v12, %v1603_v40  ;;  %v590_v57 = vpop.permute.xlu0 %589 }
 0x2bf   : > { %v593_v24 = vsel %vm378_vm6, %v1737_v51, %v590_v57  ;;  %v595_v25 = vsel %vm378_vm6, %v590_v57, %v1737_v51  ;;  %696 = vmatpush1.bf16.msra.mxu1 %v1951_v50 }
 0x2c0   : > { %v592_v41 = vpop.permute.xlu1 %591  ;;  %v668_v2 = vpack.c.bf16 %v644_v56, %v642_v14  ;;  %v667_v42 = vpack.c.bf16 %v643_v49, %v641_v13  ;;  %v645_v3 = vmul.f32 %v593_v24, %v1626_v15  ;;  %v646_v26 = vmul.f32 %v595_v25, %v1628_v16 }
 0x2c1   : > { %v594_v39 = vsel %vm378_vm6, %v1739_v52, %v592_v41  ;;  %v596_v40 = vsel %vm378_vm6, %v592_v41, %v1739_v52 }
 0x2c2   : > { %v647_v51 = vmul.f32 %v594_v39, %v1621_v62  ;;  %v648_v61 = vmul.f32 %v596_v40, %v1624_v11  ;;  %v602_v17 = vpop.permute.xlu0 %601  ;;  %697 = vmatprep.subr.bf16.mxu1 %v668_v2 }
 0x2c3   : > { %v605_v31 = vsel %vm391_vm7, %v1741_v53, %v602_v17  ;;  %v607_v19 = vsel %vm391_vm7, %v602_v17, %v1741_v53  ;;  %698 = vmatpush1.bf16.msra.mxu1 %v667_v42 }
 0x2c4   : > { %v604_v52 = vpop.permute.xlu1 %603  ;;  %v670_v29 = vpack.c.bf16 %v648_v61, %v646_v26  ;;  %v669_v15 = vpack.c.bf16 %v647_v51, %v645_v3  ;;  %v649_v16 = vmul.f32 %v605_v31, %v1647_v43  ;;  %v650_v0 = vmul.f32 %v607_v19, %v1649_v44 }
 0x2c5   : > { %v606_v62 = vsel %vm391_vm7, %v1743_v54, %v604_v52  ;;  %v608_v11 = vsel %vm391_vm7, %v604_v52, %v1743_v54 }
 0x2c6   : > { %v651_v27 = vmul.f32 %v606_v62, %v1642_v37  ;;  %v652_v53 = vmul.f32 %v608_v11, %v1645_v38  ;;  %v614_v1 = vpop.permute.xlu0 %613  ;;  %699 = vmatprep.subr.bf16.mxu1 %v670_v29 }
 0x2c7   : > { %v617_v28 = vsel %vm404_vm8, %v610_v4, %v614_v1  ;;  %v619_v30 = vsel %vm404_vm8, %v614_v1, %v610_v4  ;;  %700 = vmatpush1.bf16.msra.mxu1 %v669_v15  ;;  %v1955_v4 = vld [vmem:[#allocation18_spill] sm:$0xff] }
 0x2c8   : > { %v616_v32 = vpop.permute.xlu1 %615  ;;  %v672_v21 = vpack.c.bf16 %v652_v53, %v650_v0  ;;  %v671_v54 = vpack.c.bf16 %v651_v27, %v649_v16  ;;  %v653_v38 = vmul.f32 %v617_v28, %v1668_v22  ;;  %v654_v44 = vmul.f32 %v619_v30, %v1670_v23  ;;  %v1954_v22 = vld [vmem:[#allocation15_spill] sm:$0xff] }
 0x2c9   : > { %v618_v43 = vsel %vm404_vm8, %v612_v35, %v616_v32  ;;  %v620_v37 = vsel %vm404_vm8, %v616_v32, %v612_v35 }
 0x2ca   : > { %v655_v33 = vmul.f32 %v618_v43, %v1663_v20  ;;  %v656_v59 = vmul.f32 %v620_v37, %v1952_v58  ;;  %701 = vmatprep.subr.bf16.mxu1 %v672_v21 }
 0x2cb   : > { %702 = vmatpush1.bf16.msra.mxu1 %v671_v54 }
 0x2cc   : > { %v674_v34 = vpack.c.bf16 %v656_v59, %v654_v44  ;;  %v673_v47 = vpack.c.bf16 %v655_v33, %v653_v38 }
 0x2ce   : > { %703 = vmatprep.subr.bf16.mxu1 %v674_v34 }
 0x2cf   : > { %704 = vmatpush1.bf16.msra.mxu1 %v673_v47 }
 0x2d2   : > { %720 = vmatmul.mubr.bf16.vlgmr.msra.gmra.mrb[0].mxu1 %v975_v45 }
 0x3a5   : > { %v721_v6 = vpop.f32.mrb[0].mxu1 }
 0x3a6   : > { %v722_v48 = vadd.f32 %v721_v6, %v1953_v46  ;;  %v723_v60 = vpop.f32.mrb[1].mxu1 }
 0x3a7   : > { %v724_v20 = vadd.f32 %v723_v60, %v1954_v22  ;;  %v725_v23 = vpop.f32.mrb[2].mxu1 }
 0x3a8   : > { %v730_v63 = vmax.f32 %v722_v48, 0.0  ;;  %v726_v35 = vadd.f32 %v725_v23, %v1955_v4  ;;  %v727_v55 = vpop.f32.mrb[3].mxu1 }
 0x3a9   : > { %v731_v18 = vmax.f32 %v724_v20, 0.0  ;;  %v728_v36 = vadd.f32 %v727_v55, %v1956_v9 }
 0x3aa   : > { %734 = vst [vmem:[%s259_s29] sm:$0xff] %v730_v63  ;;  %v732_v8 = vmax.f32 %v726_v35, 0.0 }
 0x3ab   : > { %735 = vst [vmem:[%s259_s29 + $0x8] sm:$0xff] %v731_v18  ;;  %v733_v5 = vmax.f32 %v728_v36, 0.0 }
 0x3ac   : > { %736 = vst [vmem:[%s259_s29 + $0x10] sm:$0xff] %v732_v8 }
 0x3ad   : > { %737 = vst [vmem:[%s259_s29 + $0x18] sm:$0xff] %v733_v5 }
 0x3ae   : > { %1105 = shalt.err (!%p1102_p4)
}
 0x3af   : > { %s1106_s9 = scalar_lea.hbm %s1871_s8, 512  ;;  %s1110_s30 = scalar_lea.hbm %s1920_s4, 1024 }
 0x3b0   : > { %p1107_p9 = scmp.ne.s32.totalorder %s1871_s8, %s1106_s9  ;;  %p1111_p8 = scmp.lt.u32.totalorder %s1871_s8, %s1920_s4 }
 0x3b1   : > { %p1112_p13 = scmp.lt.u32.totalorder %s1110_s30, %s1106_s9  ;;  %p1114_p10 = scmp.lt.u32.totalorder %s1106_s9, %s1871_s8 }
 0x3b2   : > { %p1108_p0 = pnand %p1107_p9, %p1356_p5 }
 0x3b3   : > { %p1113_p6 = por %p1112_p13, %p1111_p8 }
 0x3b4   : > { %p1109_p11 = pneg %p1108_p0 }
 0x3b5   : > { %p1115_p3 = por %p1114_p10, %p1113_p6 }
 0x3b7   : > { %p1116_p7 = pnand %p1115_p3, %p1109_p11 }
 0x3b9   : > { %1119 = shalt.err (!%p1116_p7)
}
 0x3ba   : > { %s1185_s7 = smov 256  }
 0x3bb   : > { %896 = dma.vmem_to_hbm [thread:$0]  (%p1356_p5), %s1866_s6, 512, %s1871_s8, %s739_s19, %s1185_s7, %s1185_s7, %s1177_s21  }
 0x3bc PF: > { %s767_s10 = sand.u32 1, %s1154_s15   ;;  %p1957_p12 = scmp.ne.s32.totalorder %s1931_s22, 0 }
 0x3bd   : > { %p1958_p1 = scmp.ge.s32.totalorder %s1166_s18, 2  ;;  %s768_s11 = scalar_lea.sflag [#allocation4], %s767_s10 }
 0x3bf   : > { %p913_p2 = pnand %p1958_p1, %p1957_p12 }
 0x3c1   : > { %1149 = dma.done.wait (!%p913_p2), %s768_s11, 512  }
 0x3c2   : > { %1151 = vsyncadd (!%p913_p2), %s768_s11, 4294966784  ;;  %p19_p4 = scmp.ge.s32.totalorder %s1324_s27, 4   ;;  %s1959_s15 = smov %s1158_s16 }
 0x3c3   : > { %s1960_s16 = smov %s1162_s17  ;;  %s1961_s17 = smov %s1352_s26 }
 0x3c4   : > { %s1962_s18 = smov %s1324_s27  ;;  %21 = sbr.rel (!%p19_p4) target bundleno = 7 (0x7), region = 93 }
 0x3cb   :  { %773 = vsyncpa [#allocation3], 1 }
 0x3cc   :  { %775 = vsyncpa [#allocation3 + $0x1], 1 }
 0x3cd   :  { %776 = vsyncpa [#allocation6], 1 }
 0x3ce   :  { %777 = vsyncpa [#allocation9], 1 }
 0x3cf   :  { %778 = vsyncpa [#allocation4], 1 }
 0x3d0   :  { %780 = vsyncpa [#allocation4 + $0x1], 1 }

</bundles_post_ra>
